<compile_context>
chip_gen: v7x
topology: tpu7x:2x2x1
jax: 0.10.0
libtpu: 0.0.40
codegen_flags: <defaults>
</compile_context>

<pallas_src>
import jax
import jax.numpy as jnp
from jax.experimental import pallas as pl
from jax.experimental.pallas import tpu as pltpu


def _ceil_to(x, m):
    return ((x + m - 1) // m) * m


def _inverse_dynamics_kernel(obs_ref, nxt_ref, w1a_ref, w1b_ref, b1_ref,
                             w2_ref, b2_ref, o_ref):
    """out = relu(obs @ w1a + next_obs @ w1b + b1) @ w2 + b2  (fused concat).

    obs_ref / nxt_ref: (tb, L)   f32   VMEM (batch tile)
    w1a_ref / w1b_ref: (L, 256)  bf16  VMEM (resident)
    b1_ref:            (1, 256)  f32   VMEM (resident)
    w2_ref:            (256, A)  bf16  VMEM (resident)
    b2_ref:            (1, A)    f32   VMEM (resident)
    o_ref:             (tb, A)   f32   VMEM (batch tile, unpadded N)
    """
    x_dtype = w1a_ref.dtype
    # First layer: two half-K matmuls replace cat([obs, next_obs]) @ W1.
    h = (jnp.dot(obs_ref[...].astype(x_dtype), w1a_ref[...],
                 preferred_element_type=jnp.float32)
         + jnp.dot(nxt_ref[...].astype(x_dtype), w1b_ref[...],
                   preferred_element_type=jnp.float32)
         + b1_ref[...])
    h = jnp.maximum(h, 0.0)
    # Second layer on the MXU (f32 accumulation), bias add in f32.
    out = jnp.dot(h.astype(w2_ref.dtype), w2_ref[...],
                  preferred_element_type=jnp.float32) + b2_ref[...]
    o_ref[...] = out.astype(o_ref.dtype)


def pack_params(params, *, use_bf16=True):
    """One-time parameter preprocessing. Call ONCE outside the hot path.

    Splits W1 so the feature-concat never materializes, casts MXU operands
    to bf16 and reshapes biases to (1, N) rows.
    """
    two_l, hidden = params["w1"].shape
    latent = two_l // 2
    act = params["w2"].shape[1]
    mxu_dtype = jnp.bfloat16 if use_bf16 else jnp.float32
    return {
        "w1a": params["w1"][:latent].astype(mxu_dtype),
        "w1b": params["w1"][latent:].astype(mxu_dtype),
        "b1": params["b1"].reshape(1, hidden).astype(jnp.float32),
        "w2": params["w2"].astype(mxu_dtype),
        "b2": params["b2"].reshape(1, act).astype(jnp.float32),
    }


def inverse_dynamics_forward(obs, next_obs, packed, *, block_b=4096):
    """Pallas-backed forward pass of InverseDynamicsModel.

    obs, next_obs: [B, latent_dim] float32
    packed: output of pack_params()
    returns: [B, action_dim] float32
    """
    B, L = obs.shape
    H = packed["w1a"].shape[1]          # 256
    A = packed["w2"].shape[1]           # action_dim
    bytes_per = jnp.dtype(packed["w1a"].dtype).itemsize

    # --- Batch tile selection -------------------------------------------
    # Multiple of 16 (bf16 sublane packing), as large as block_b allows, but
    # capped so batches >= 32 rows always produce >= 2 grid steps (gives
    # v7x's two TensorCores work under dimension_semantics=("parallel",)).
    b_ceil = _ceil_to(max(B, 16), 16)
    tb = min(_ceil_to(block_b, 16), b_ceil)
    if tb >= b_ceil and b_ceil >= 32:
        tb = max(16, (b_ceil // 2) // 16 * 16)
    b_pad = _ceil_to(B, tb)

    if b_pad != B:
        obs = jnp.pad(obs, ((0, b_pad - B), (0, 0)))
        next_obs = jnp.pad(next_obs, ((0, b_pad - B), (0, 0)))
    grid = (b_pad // tb,)

    batched = lambda shape: pl.BlockSpec(shape, lambda i: (i, 0))
    resident = lambda shape: pl.BlockSpec(shape, lambda i: (0, 0))

    # --- Explicit VMEM budget (portable across v5e/v6e/v7x) --------------
    live_bytes = (
        2 * (2 * tb * L * 4)                 # obs + nxt f32 tiles, double-buffered
        + 2 * (tb * A * 4)                   # output f32 tile, double-buffered
        + tb * H * (4 + bytes_per)           # hidden activation f32 + bf16 copy
        + 2 * ((2 * L * H + H * A) * bytes_per + (H + A) * 4))  # resident params
    vmem_limit = int(min(max(2 * live_bytes, 32 << 20), 48 << 20))

    cost = pl.CostEstimate(
        flops=2 * b_pad * (2 * L * H + H * A),
        transcendentals=0,
        bytes_accessed=(2 * b_pad * L * 4                     # obs + next_obs (f32)
                        + (2 * L * H + H * A) * bytes_per     # weights
                        + (H + A) * 4                         # biases
                        + b_pad * A * 4),                     # unpadded output
    )

    out = pl.pallas_call(
        _inverse_dynamics_kernel,
        out_shape=jax.ShapeDtypeStruct((b_pad, A), jnp.float32),
        grid=grid,
        in_specs=[
            batched((tb, L)),        # obs tile
            batched((tb, L)),        # next_obs tile
            resident((L, H)),        # w1a (resident across batch grid)
            resident((L, H)),        # w1b
            resident((1, H)),        # b1
            resident((H, A)),        # w2 (unpadded N; full-array block)
            resident((1, A)),        # b2
        ],
        out_specs=batched((tb, A)),
        compiler_params=pltpu.CompilerParams(
            dimension_semantics=("parallel",),
            vmem_limit_bytes=vmem_limit),
        cost_estimate=cost,
    )(obs, next_obs, packed["w1a"], packed["w1b"], packed["b1"],
      packed["w2"], packed["b2"])

    return out if b_pad == B else out[:B]


def init_params(latent_dim, action_dim, key):
    """Deterministic init mimicking nn.Linear (uniform +-1/sqrt(fan_in))."""
    k1, k2, k3, k4 = jax.random.split(key, 4)
    bound1 = 1.0 / jnp.sqrt(2 * latent_dim)
    bound2 = 1.0 / jnp.sqrt(256)
    return {
        "w1": jax.random.uniform(k1, (2 * latent_dim, 256), jnp.float32,
                                 -bound1, bound1),
        "b1": jax.random.uniform(k2, (256,), jnp.float32, -bound1, bound1),
        "w2": jax.random.uniform(k3, (256, action_dim), jnp.float32,
                                 -bound2, bound2),
        "b2": jax.random.uniform(k4, (action_dim,), jnp.float32,
                                 -bound2, bound2),
    }


def _reference_f32(obs, next_obs, params):
    x = jnp.concatenate([obs, next_obs], axis=1)
    h = jnp.maximum(x @ params["w1"] + params["b1"], 0.0)
    return h @ params["w2"] + params["b2"]


def _reference_bf16(obs, next_obs, params):
    """Emulates the kernel's bf16-operand / f32-accumulate arithmetic."""
    L = obs.shape[1]
    w1a = params["w1"][:L].astype(jnp.bfloat16)
    w1b = params["w1"][L:].astype(jnp.bfloat16)
    h = (jnp.dot(obs.astype(jnp.bfloat16), w1a,
                 preferred_element_type=jnp.float32)
         + jnp.dot(next_obs.astype(jnp.bfloat16), w1b,
                   preferred_element_type=jnp.float32)
         + params["b1"].astype(jnp.float32))
    h = jnp.maximum(h, 0.0)
    return (jnp.dot(h.astype(jnp.bfloat16),
                    params["w2"].astype(jnp.bfloat16),
                    preferred_element_type=jnp.float32)
            + params["b2"].astype(jnp.float32))


if __name__ == "__main__":
    latent_dim = 32
    action_dim = 8

    key = jax.random.PRNGKey(0)
    k_obs, k_next, k_params = jax.random.split(key, 3)
    params = init_params(latent_dim, action_dim, k_params)

    # One-time parameter packing (hoisted out of the hot path).
    packed = pack_params(params, use_bf16=True)

    # Case 1: small batch, single grid step.
    batch = 8
    obs = jax.random.normal(k_obs, (batch, latent_dim), jnp.float32)
    next_obs = jax.random.normal(k_next, (batch, latent_dim), jnp.float32)

    out = inverse_dynamics_forward(obs, next_obs, packed)
    out = jax.block_until_ready(out)
    assert out.shape == (batch, action_dim)
    # Tight check vs an exact emulation of the kernel's bf16/f32 arithmetic.
    assert jnp.allclose(out, _reference_bf16(obs, next_obs, params),
                        atol=1e-3, rtol=1e-3)
    # Loose check vs the full-f32 PyTorch-semantics reference.
    assert jnp.allclose(out, _reference_f32(obs, next_obs, params),
                        atol=5e-2, rtol=5e-2)

    # Case 2: ragged batch with multiple grid steps (exercises tiling + pad).
    batch2 = 20
    k_obs2, k_next2 = jax.random.split(jax.random.PRNGKey(1), 2)
    obs2 = jax.random.normal(k_obs2, (batch2, latent_dim), jnp.float32)
    next_obs2 = jax.random.normal(k_next2, (batch2, latent_dim), jnp.float32)

    out2 = inverse_dynamics_forward(obs2, next_obs2, packed, block_b=8)
    out2 = jax.block_until_ready(out2)
    assert out2.shape == (batch2, action_dim)
    assert jnp.allclose(out2, _reference_bf16(obs2, next_obs2, params),
                        atol=1e-3, rtol=1e-3)
    assert jnp.allclose(out2, _reference_f32(obs2, next_obs2, params),
                        atol=5e-2, rtol=5e-2)

    print("KERNEL_OK")
</pallas_src>

<mosaic_0001>
module attributes {stable_mosaic.version = 11 : i64} {
  func.func @_inverse_dynamics_kernel(%arg0: i32, %arg1: memref<16x32xf32, #tpu.memory_space<vmem>>, %arg2: memref<16x32xf32, #tpu.memory_space<vmem>>, %arg3: memref<32x256xbf16, #tpu.memory_space<vmem>>, %arg4: memref<32x256xbf16, #tpu.memory_space<vmem>>, %arg5: memref<1x256xf32, #tpu.memory_space<vmem>>, %arg6: memref<256x8xbf16, #tpu.memory_space<vmem>>, %arg7: memref<1x8xf32, #tpu.memory_space<vmem>>, %arg8: memref<16x8xf32, #tpu.memory_space<vmem>>) attributes {dimension_semantics = [#tpu.dimension_semantics<parallel>], iteration_bounds = array<i64: 1>, scalar_prefetch = 0 : i64, scratch_operands = 0 : i64, tpu.core_type = #tpu.core_type<tc>, window_params = [{transform_indices = @transform_0, window_bounds = array<i64: 16, 32>}, {transform_indices = @transform_1, window_bounds = array<i64: 16, 32>}, {pipeline_mode = #tpu.pipeline_mode<synchronous>, transform_indices = @transform_2, window_bounds = array<i64: 32, 256>}, {pipeline_mode = #tpu.pipeline_mode<synchronous>, transform_indices = @transform_3, window_bounds = array<i64: 32, 256>}, {pipeline_mode = #tpu.pipeline_mode<synchronous>, transform_indices = @transform_4, window_bounds = array<i64: 1, 256>}, {pipeline_mode = #tpu.pipeline_mode<synchronous>, transform_indices = @transform_5, window_bounds = array<i64: 256, 8>}, {pipeline_mode = #tpu.pipeline_mode<synchronous>, transform_indices = @transform_6, window_bounds = array<i64: 1, 8>}, {transform_indices = @transform_7, window_bounds = array<i64: 16, 8>}]} {
    %c0 = arith.constant 0 : index
    %c0_0 = arith.constant 0 : index
    %0 = vector.load %arg1[%c0, %c0_0] : memref<16x32xf32, #tpu.memory_space<vmem>>, vector<16x32xf32>
    %1 = arith.truncf %0 : vector<16x32xf32> to vector<16x32xbf16>
    %c0_1 = arith.constant 0 : index
    %c0_2 = arith.constant 0 : index
    %2 = vector.load %arg3[%c0_1, %c0_2] : memref<32x256xbf16, #tpu.memory_space<vmem>>, vector<32x256xbf16>
    %cst = arith.constant dense<0.000000e+00> : vector<16x256xf32>
    %3 = tpu.matmul %1, %2, %cst {dimension_numbers = #tpu.dot_dimension_numbers<[1], [0], [0], [1], [0, 0, 1, 1], [], []>} : vector<16x32xbf16>, vector<32x256xbf16>, vector<16x256xf32> -> vector<16x256xf32>
    %c0_3 = arith.constant 0 : index
    %c0_4 = arith.constant 0 : index
    %4 = vector.load %arg2[%c0_3, %c0_4] : memref<16x32xf32, #tpu.memory_space<vmem>>, vector<16x32xf32>
    %5 = arith.truncf %4 : vector<16x32xf32> to vector<16x32xbf16>
    %c0_5 = arith.constant 0 : index
    %c0_6 = arith.constant 0 : index
    %6 = vector.load %arg4[%c0_5, %c0_6] : memref<32x256xbf16, #tpu.memory_space<vmem>>, vector<32x256xbf16>
    %cst_7 = arith.constant dense<0.000000e+00> : vector<16x256xf32>
    %7 = tpu.matmul %5, %6, %cst_7 {dimension_numbers = #tpu.dot_dimension_numbers<[1], [0], [0], [1], [0, 0, 1, 1], [], []>} : vector<16x32xbf16>, vector<32x256xbf16>, vector<16x256xf32> -> vector<16x256xf32>
    %8 = arith.addf %3, %7 : vector<16x256xf32>
    %c0_8 = arith.constant 0 : index
    %c0_9 = arith.constant 0 : index
    %9 = vector.load %arg5[%c0_8, %c0_9] : memref<1x256xf32, #tpu.memory_space<vmem>>, vector<1x256xf32>
    %10 = vector.broadcast %9 : vector<1x256xf32> to vector<16x256xf32>
    %11 = arith.addf %8, %10 : vector<16x256xf32>
    %cst_10 = arith.constant 0.000000e+00 : f32
    %12 = vector.broadcast %cst_10 : f32 to vector<16x256xf32>
    %13 = arith.maximumf %11, %12 : vector<16x256xf32>
    %14 = arith.truncf %13 : vector<16x256xf32> to vector<16x256xbf16>
    %c0_11 = arith.constant 0 : index
    %c0_12 = arith.constant 0 : index
    %15 = vector.load %arg6[%c0_11, %c0_12] : memref<256x8xbf16, #tpu.memory_space<vmem>>, vector<256x8xbf16>
    %cst_13 = arith.constant dense<0.000000e+00> : vector<16x8xf32>
    %16 = tpu.matmul %14, %15, %cst_13 {dimension_numbers = #tpu.dot_dimension_numbers<[1], [0], [0], [1], [0, 0, 1, 1], [], []>} : vector<16x256xbf16>, vector<256x8xbf16>, vector<16x8xf32> -> vector<16x8xf32>
    %c0_14 = arith.constant 0 : index
    %c0_15 = arith.constant 0 : index
    %17 = vector.load %arg7[%c0_14, %c0_15] : memref<1x8xf32, #tpu.memory_space<vmem>>, vector<1x8xf32>
    %18 = vector.broadcast %17 : vector<1x8xf32> to vector<16x8xf32>
    %19 = arith.addf %16, %18 : vector<16x8xf32>
    %c0_16 = arith.constant 0 : index
    %c0_17 = arith.constant 0 : index
    %20 = vector.load %arg8[%c0_16, %c0_17] : memref<16x8xf32, #tpu.memory_space<vmem>>, vector<16x8xf32>
    tpu.vector_store %arg8[%c0_16, %c0_17], %19 {strides = array<i32>} : memref<16x8xf32, #tpu.memory_space<vmem>>, vector<16x8xf32>,
    return
  }
  func.func @transform_0(%arg0: i32) -> (i32, i32) {
    %c0_i32 = arith.constant 0 : i32
    %c0_i32_0 = arith.constant 0 : i32
    return %arg0, %c0_i32 : i32, i32
  }
  func.func @transform_1(%arg0: i32) -> (i32, i32) {
    %c0_i32 = arith.constant 0 : i32
    %c0_i32_0 = arith.constant 0 : i32
    return %arg0, %c0_i32 : i32, i32
  }
  func.func @transform_2(%arg0: i32) -> (i32, i32) {
    %c0_i32 = arith.constant 0 : i32
    %c0_i32_0 = arith.constant 0 : i32
    %c0_i32_1 = arith.constant 0 : i32
    return %c0_i32, %c0_i32_0 : i32, i32
  }
  func.func @transform_3(%arg0: i32) -> (i32, i32) {
    %c0_i32 = arith.constant 0 : i32
    %c0_i32_0 = arith.constant 0 : i32
    %c0_i32_1 = arith.constant 0 : i32
    return %c0_i32, %c0_i32_0 : i32, i32
  }
  func.func @transform_4(%arg0: i32) -> (i32, i32) {
    %c0_i32 = arith.constant 0 : i32
    %c0_i32_0 = arith.constant 0 : i32
    %c0_i32_1 = arith.constant 0 : i32
    return %c0_i32, %c0_i32_0 : i32, i32
  }
  func.func @transform_5(%arg0: i32) -> (i32, i32) {
    %c0_i32 = arith.constant 0 : i32
    %c0_i32_0 = arith.constant 0 : i32
    %c0_i32_1 = arith.constant 0 : i32
    return %c0_i32, %c0_i32_0 : i32, i32
  }
  func.func @transform_6(%arg0: i32) -> (i32, i32) {
    %c0_i32 = arith.constant 0 : i32
    %c0_i32_0 = arith.constant 0 : i32
    %c0_i32_1 = arith.constant 0 : i32
    return %c0_i32, %c0_i32_0 : i32, i32
  }
  func.func @transform_7(%arg0: i32) -> (i32, i32) {
    %c0_i32 = arith.constant 0 : i32
    %c0_i32_0 = arith.constant 0 : i32
    return %arg0, %c0_i32 : i32, i32
  }
}

</mosaic_0001>

<bundles_post_ra>
// kernel: tpu_custom_call.1
= control target key start
LH: loop header
LB: loop body
LE: loop exit
PB: predicated region body
PF: predicated region fallthrough
CT: control target
= control target key end

     0   :  { %v461_v1 = vmov 0   ;;  %vm61_vm0 = vcmask 261120   ;;  %v176_v31 = vlaneseq  ;;  %vm372_vm1 = vcmask 64512   ;;  %s600_s3 = inlined_call_operand.vmem [shape: bf16[32,256], index: 3, kind: input, shape index: {}]   ;;  %s601_s1 = inlined_call_operand.vmem [shape: f32[16,32], index: 1, kind: input, shape index: {}]   ;;  %s602_s2 = inlined_call_operand.vmem [shape: bf16[32,256], index: 2, kind: input, shape index: {}]   ;;  %s603_s5 = inlined_call_operand.vmem [shape: bf16[256,8], index: 5, kind: input, shape index: {}]   ;;  %s604_s0 = inlined_call_operand.vmem [shape: f32[16,32], index: 0, kind: input, shape index: {}]   ;;  %s605_s4 = inlined_call_operand.vmem [shape: f32[1,256], index: 4, kind: input, shape index: {}]   ;;  %s606_s6 = inlined_call_operand.vmem [shape: f32[1,8], index: 6, kind: input, shape index: {}]   ;;  %s607_s7 = inlined_call_operand.vmem [shape: f32[16,8], index: 7, kind: output, shape index: {}]  }
   0x1   :  { %v433_v0 = vld [vmem:[%s600_s3 + $0x4] ss:$8 sps:$4 sm:$0xff]   ;;  %97 = vmatprep.mubr.bf16.mxu0 %v461_v1  ;;  %v435_v2 = vld [vmem:[%s600_s3] ss:$8 sps:$4 sm:$0xff]   ;;  %v436_v3 = vld [vmem:[%s600_s3 + $0x14] ss:$8 sps:$4 sm:$0xff]  }
   0x2   :  { %65 = vmatprep.subr.bf16.mxu0 %v433_v0  ;;  %v438_v4 = vld [vmem:[%s600_s3 + $0x10] ss:$8 sps:$4 sm:$0xff]   ;;  %v34_v5 = vld [vmem:[%s601_s1] sm:$0xff]  ;;  %v35_v6 = vld [vmem:[%s601_s1 + $0x8] sm:$0xff]  ;;  %v177_v32 = vshrl.u32 %v176_v31, 7 }
   0x3   :  { %66 = vmatpush1.bf16.msra.mxu0 %v435_v2  ;;  %v441_v7 = vld [vmem:[%s602_s2 + $0x4] ss:$8 sps:$4 sm:$0xff]   ;;  %v36_v8 = vpack.c.bf16 %v35_v6, %v34_v5  ;;  %v439_v9 = vld [vmem:[%s602_s2] ss:$8 sps:$4 sm:$0xff]   ;;  %v444_v10 = vld [vmem:[%s602_s2 + $0x14] ss:$8 sps:$4 sm:$0xff]  }
   0x4   :  { %67 = vmatprep.subr.bf16.mxu0 %v436_v3  ;;  %v445_v11 = vld [vmem:[%s603_s5 + $0x40] sm:$0xff]   ;;  %v442_v13 = vld [vmem:[%s602_s2 + $0x10] ss:$8 sps:$4 sm:$0xff]   ;;  %v447_v14 = vld [vmem:[%s603_s5 + $0x48] sm:$0xff]   ;;  %v178_v33 = vsub.s32 0, %v177_v32  ;;  %v182_v35 = vsub.s32 1, %v177_v32 }
   0x5   :  { %v446_v12 = vld [vmem:[%s603_s5] sm:$0xff]   ;;  %406 = vmatprep.subr.bf16.mxu1 %v445_v11  ;;  %v448_v15 = vld [vmem:[%s603_s5 + $0x8] sm:$0xff]   ;;  %v449_v16 = vld [vmem:[%s603_s5 + $0x50] sm:$0xff]  }
   0x6   :  { %407 = vmatpush3.bf16.msra.mxu1 %v446_v12  ;;  %v27_v17 = vld [vmem:[%s604_s0] sm:$0xff]  ;;  %v28_v18 = vld [vmem:[%s604_s0 + $0x8] sm:$0xff]  ;;  %v450_v19 = vld [vmem:[%s603_s5 + $0x10] sm:$0xff]  }
   0x7   :  { %68 = vmatpush1.bf16.msra.mxu0 %v438_v4  ;;  %408 = vmatprep.subr.bf16.mxu1 %v447_v14  ;;  %v451_v20 = vld [vmem:[%s603_s5 + $0x58] sm:$0xff]   ;;  %v453_v22 = vld [vmem:[%s603_s5 + $0x60] sm:$0xff]   ;;  %v29_v23 = vpack.c.bf16 %v28_v18, %v27_v17  ;;  %v455_v25 = vld [vmem:[%s603_s5 + $0x68] sm:$0xff]  }
   0x8   :  { %131 = vmatprep.subr.bf16.mxu0 %v441_v7  ;;  %v452_v21 = vld [vmem:[%s603_s5 + $0x18] sm:$0xff]   ;;  %v454_v24 = vld [vmem:[%s603_s5 + $0x20] sm:$0xff]   ;;  %v456_v26 = vld [vmem:[%s603_s5 + $0x28] sm:$0xff]  }
   0x9   :  { %v457_v27 = vld [vmem:[%s603_s5 + $0x70] sm:$0xff]   ;;  %v459_v29 = vld [vmem:[%s603_s5 + $0x78] sm:$0xff]   ;;  %v174_v34 = vld [vmem:[%s605_s4] sm:$0x3] }
   0xa   :  { %383 = vmatmul.mubr.msk.bf16.vlgmr.msra.gmra.mrb[0].mxu0 %vm61_vm0, %v36_v8  ;;  %409 = vmatpush3.bf16.msra.mxu1 %v448_v15  ;;  %v458_v28 = vld [vmem:[%s603_s5 + $0x30] sm:$0xff]   ;;  %v460_v30 = vld [vmem:[%s603_s5 + $0x38] sm:$0xff]   ;;  %v179_v36 = vrot.slane %v174_v34, %v178_v33  ;;  %v183_v37 = vrot.slane %v174_v34, %v182_v35  ;;  %v389_v53 = vld [vmem:[%s606_s6] ss:$0 sm:$0xff] }
   0xb   :  { %132 = vmatpush1.bf16.msra.mxu0 %v439_v9  ;;  %163 = vmatprep.mubr.bf16.mxu0 %v461_v1 }
   0xc   :  { %133 = vmatprep.subr.bf16.mxu0 %v444_v10  ;;  %410 = vmatprep.subr.bf16.mxu1 %v449_v16 }
   0xe   :  { %411 = vmatpush3.bf16.msra.mxu1 %v450_v19 }
   0xf   :  { %134 = vmatpush1.bf16.msra.mxu0 %v442_v13  ;;  %412 = vmatprep.subr.bf16.mxu1 %v451_v20 }
  0x12   :  { %413 = vmatpush3.bf16.msra.mxu1 %v452_v21 }
  0x13   :  { %414 = vmatprep.subr.bf16.mxu1 %v453_v22 }
  0x16   :  { %388 = vmatmul.mubr.msk.bf16.vlgmr.msra.gmra.mrb[0].mxu0 %vm61_vm0, %v29_v23  ;;  %415 = vmatpush3.bf16.msra.mxu1 %v454_v24 }
  0x17   :  { %416 = vmatprep.subr.bf16.mxu1 %v455_v25 }
  0x1a   :  { %417 = vmatpush3.bf16.msra.mxu1 %v456_v26 }
  0x1b   :  { %418 = vmatprep.subr.bf16.mxu1 %v457_v27 }
  0x1e   :  { %419 = vmatpush3.bf16.msra.mxu1 %v458_v28 }
  0x1f   :  { %420 = vmatprep.subr.bf16.mxu1 %v459_v29 }
  0x22   :  { %421 = vmatpush3.bf16.msra.mxu1 %v460_v30 }
  0xe9   :  { %v165_v38 = vpop.f32.mrb[0].mxu0 }
  0xea   :  { %v186_v39 = vadd.f32 %v179_v36, %v165_v38  ;;  %v167_v40 = vpop.f32.mrb[1].mxu0 }
  0xeb   :  { %v187_v41 = vadd.f32 %v183_v37, %v167_v40  ;;  %v169_v42 = vpop.f32.mrb[2].mxu0 }
  0xec   :  { %v188_v43 = vadd.f32 %v179_v36, %v169_v42  ;;  %v171_v44 = vpop.f32.mrb[3].mxu0  ;;  %v190_v46 = vmax.f32 %v186_v39, 0.0 }
  0xed   :  { %v189_v45 = vadd.f32 %v183_v37, %v171_v44  ;;  %v191_v48 = vmax.f32 %v187_v41, 0.0 }
  0xee   :  { %v192_v47 = vmax.f32 %v188_v43, 0.0 }
  0xef   :  { %v193_v49 = vmax.f32 %v189_v45, 0.0 }
  0xf0   :  { %v194_v50 = vpack.c.bf16 %v192_v47, %v190_v46 }
  0xf1   :  { %v195_v51 = vpack.c.bf16 %v193_v49, %v191_v48 }
  0xf3   :  { %363 = vmatprep.mubr.bf16.mxu1 %v195_v51 }
  0xf4   :  { %364 = vmatmul.mubr.bf16.vlgmr.msra.gmra.mrb[0].mxu1 %v194_v50 }
 0x1c7   :  { %v422_v52 = vpop.f32.mrb[0].mxu1 }
 0x1c8   :  { %v423_v54 = vpop.f32.mrb[1].mxu1 }
 0x1c9   :  { %v424_v55 = vadd.f32 %v423_v54, %v422_v52  ;;  %v425_v56 = vpop.f32.mrb[2].mxu1 }
 0x1ca   :  { %v426_v57 = vpop.f32.mrb[3].mxu1 }
 0x1cb   :  { %v366_v58 = vadd.f32 %v424_v55, %v389_v53  ;;  %v427_v59 = vadd.f32 %v426_v57, %v425_v56 }
 0x1cd   :  { %373 = vst.msk [vmem:[%s607_s7] sm:$0xff] %vm372_vm1, %v366_v58  ;;  %v369_v60 = vadd.f32 %v427_v59, %v389_v53 }
 0x1cf   :  { %374 = vst.msk [vmem:[%s607_s7 + $0x8] sm:$0xff] %vm372_vm1, %v369_v60 }

</bundles_post_ra>
